<compile_context>
chip_gen: v6e
topology: v6e:2x2x1
jax: 0.10.0
libtpu: 0.0.40
codegen_flags: <defaults>
</compile_context>

<pallas_src>
import jax
import jax.numpy as jnp
from jax.experimental import pallas as pl
from jax.experimental.pallas import tpu as pltpu

EPS = 1e-5
_TB_MAX = 2048   # max batch-tile rows; double-buffered x+out at tb=2048 is < 4 MiB VMEM


def _round_up(n, m):
    return ((n + m - 1) // m) * m


def _pad_axis(a, axis, size):
    pad = size - a.shape[axis]
    if pad <= 0:
        return a
    widths = [(0, 0)] * a.ndim
    widths[axis] = (0, pad)
    return jnp.pad(a, widths)


def _batch_tiling(batch):
    """Pick (tile_rows, padded_batch, grid_steps)."""
    if batch <= 256:
        tb = _round_up(max(batch, 16), 16)     # single sublane/vreg-aligned tile
        return tb, tb, 1
    # Large batches: big tiles to amortize per-step overhead, but keep >= 2 grid
    # steps so the "parallel" batch axis can shard across v7x's two TensorCores.
    steps = max(2, pl.cdiv(batch, _TB_MAX))
    tb = _round_up(pl.cdiv(batch, steps), 16)
    return tb, steps * tb, steps


def mlp_from_latent_kernel(x_ref, w1_ref, b1_ref, w2_ref, b2_ref, o_ref):
    # --- Linear(d_in, d_hidden) + bias + ReLU ---
    # x arrives f32 straight from HBM (no wrapper pad/cast pass); cast to bf16
    # in-register for the MXU, accumulate in f32.
    x = x_ref[...].astype(jnp.bfloat16)
    h = jnp.dot(x, w1_ref[...], preferred_element_type=jnp.float32)
    h = jnp.maximum(h + b1_ref[...], 0.0)

    # BatchNorm1d (eval, running stats) is folded into w2/b2 outside the kernel.
    # Dropout(p=0.5) is identity in eval mode.

    # --- Linear(d_hidden, d_out) ---
    # Keep h and the BN-folded W2 in f32 for accuracy (compute is nowhere near the
    # bottleneck for this memory-bound kernel).
    y = jnp.dot(h, w2_ref[...], preferred_element_type=jnp.float32)
    o_ref[...] = (y + b2_ref[...]).astype(o_ref.dtype)


def init_params(key, d_in, d_hidden, d_out, dtype=jnp.float32):
    """Deterministic init mimicking PyTorch defaults (U(-1/sqrt(fan_in), 1/sqrt(fan_in)))."""
    ks = jax.random.split(key, 8)
    lim1 = 1.0 / jnp.sqrt(d_in)
    lim2 = 1.0 / jnp.sqrt(d_hidden)
    return {
        "w1": jax.random.uniform(ks[0], (d_in, d_hidden), dtype, -lim1, lim1),
        "b1": jax.random.uniform(ks[1], (1, d_hidden), dtype, -lim1, lim1),
        # BatchNorm affine params (perturbed deterministically so the BN path is non-trivial)
        "gamma": 1.0 + 0.1 * jax.random.normal(ks[2], (1, d_hidden), dtype),
        "beta": 0.1 * jax.random.normal(ks[3], (1, d_hidden), dtype),
        # running statistics (eval mode)
        "mean": 0.1 * jax.random.normal(ks[4], (1, d_hidden), dtype),
        "var": 1.0 + 0.1 * jax.random.uniform(ks[5], (1, d_hidden), dtype),
        "w2": jax.random.uniform(ks[6], (d_hidden, d_out), dtype, -lim2, lim2),
        "b2": jax.random.uniform(ks[7], (1, d_out), dtype, -lim2, lim2),
    }


def fold_and_pack_params(params):
    """Fold eval-mode BatchNorm into the 2nd Linear and pad feature dims for lane density.

    BN(h) = scale*h + shift with scale = gamma*rsqrt(var+eps), shift = beta - mean*scale.
    => y = BN(h) @ W2 + b2 = h @ (scale[:,None]*W2) + (shift @ W2 + b2).

    W1 is kept bf16 (MXU operand); the BN-folded W2/b2 stay f32 for accuracy.
    d_in is NOT padded (kernel block uses the full array dim); d_hidden / d_out are
    padded to multiples of 128 for lane-dense MXU tiles and unmasked output stores.
    """
    w1, b1 = params["w1"], params["b1"]
    w2, b2 = params["w2"], params["b2"]
    scale = params["gamma"] * jax.lax.rsqrt(params["var"] + EPS)      # (1, H)
    shift = params["beta"] - params["mean"] * scale                   # (1, H)
    w2_f = w2 * scale.reshape(-1, 1)                                  # (H, d_out)
    b2_f = b2 + shift @ w2                                            # (1, d_out)

    d_in, d_hidden = w1.shape
    d_out = w2.shape[1]
    d_h_p = _round_up(d_hidden, 128)
    d_out_p = _round_up(d_out, 128)

    return {
        "w1": _pad_axis(w1, 1, d_h_p).astype(jnp.bfloat16),           # (d_in, d_h_p)
        "b1": _pad_axis(b1, 1, d_h_p).astype(jnp.float32),            # (1, d_h_p)
        "w2": _pad_axis(_pad_axis(w2_f, 0, d_h_p), 1, d_out_p).astype(jnp.float32),
        "b2": _pad_axis(b2_f, 1, d_out_p).astype(jnp.float32),
        "d_in": d_in,
        "d_out": d_out,
    }


def mlp_from_latent_forward(inputs, packed, key="latent_3d"):
    latent = inputs[key]
    batch = latent.shape[0]
    x = latent.reshape(batch, -1)                       # glue: .view(B, -1)

    d_in, d_out = packed["d_in"], packed["d_out"]
    w1, b1, w2, b2 = packed["w1"], packed["b1"], packed["w2"], packed["b2"]
    d_h_p = w1.shape[1]
    d_out_p = w2.shape[1]
    assert x.shape[1] == d_in, "flattened latent width must equal d_in"

    tb, b_pad, steps = _batch_tiling(batch)
    if b_pad != batch:                                  # pad batch axis only (no feature pad / cast)
        x = _pad_axis(x, 0, b_pad)
    grid = (steps,)

    x_bytes = x.size * x.dtype.itemsize
    w_bytes = sum(a.size * a.dtype.itemsize for a in (w1, b1, w2, b2))
    flops = 2 * b_pad * (d_in * d_h_p + d_h_p * d_out_p)
    bytes_accessed = x_bytes + w_bytes + b_pad * d_out_p * 4

    out = pl.pallas_call(
        mlp_from_latent_kernel,
        out_shape=jax.ShapeDtypeStruct((b_pad, d_out_p), jnp.float32),
        grid_spec=pltpu.PrefetchScalarGridSpec(
            num_scalar_prefetch=0,
            grid=grid,
            in_specs=[
                pl.BlockSpec((tb, d_in), lambda i: (i, 0)),         # x: tiled over batch (f32)
                pl.BlockSpec((d_in, d_h_p), lambda i: (0, 0)),      # W1 (bf16): VMEM-resident
                pl.BlockSpec((1, d_h_p), lambda i: (0, 0)),         # b1: resident
                pl.BlockSpec((d_h_p, d_out_p), lambda i: (0, 0)),   # W2 (BN-folded, f32): resident
                pl.BlockSpec((1, d_out_p), lambda i: (0, 0)),       # b2 (BN-folded): resident
            ],
            out_specs=pl.BlockSpec((tb, d_out_p), lambda i: (i, 0)),
        ),
        compiler_params=pltpu.CompilerParams(
            dimension_semantics=("parallel",),          # shard batch tiles across v7x's 2 TCs
        ),
        cost_estimate=pl.CostEstimate(
            flops=flops, transcendentals=0, bytes_accessed=bytes_accessed),
    )(x, w1, b1, w2, b2)

    y = out[:batch, :d_out]                             # strip batch / lane padding
    return {"3D": y, "latent_3d": latent}


def _reference_forward(inputs, params, key="latent_3d"):
    latent = inputs[key]
    x = latent.reshape(latent.shape[0], -1).astype(jnp.float32)
    h = jnp.maximum(x @ params["w1"] + params["b1"], 0.0)
    h = params["gamma"] * (h - params["mean"]) * jax.lax.rsqrt(params["var"] + EPS) + params["beta"]
    return h @ params["w2"] + params["b2"]


if __name__ == "__main__":
    # Small shapes consistent with the module: latent_3d of shape (B, C, L),
    # flattened to d_in = C * L.
    B, C, L = 8, 4, 16                  # batch=8, latent features 4x16 -> d_in=64
    d_in, d_hidden, d_out = C * L, 128, 48

    root = jax.random.PRNGKey(0)
    k_latent, k_params = jax.random.split(root)

    latent_3d = jax.random.normal(k_latent, (B, C, L), jnp.float32)
    params = init_params(k_params, d_in, d_hidden, d_out)
    packed = fold_and_pack_params(params)

    out_dict = mlp_from_latent_forward({"latent_3d": latent_3d}, packed)
    y = jax.block_until_ready(out_dict["3D"])

    # correctness check against pure-JAX f32 reference (bf16 first matmul -> loose tolerance)
    y_ref = _reference_forward({"latent_3d": latent_3d}, params)
    assert y.shape == (B, d_out)
    assert out_dict["latent_3d"].shape == (B, C, L)
    assert jnp.allclose(y, y_ref, atol=2e-2, rtol=2e-2)

    print("KERNEL_OK")
</pallas_src>

<mosaic_0001>
module attributes {stable_mosaic.version = 11 : i64} {
  func.func @mlp_from_latent_kernel(%arg0: i32, %arg1: memref<16x64xf32, #tpu.memory_space<vmem>>, %arg2: memref<64x128xbf16, #tpu.memory_space<vmem>>, %arg3: memref<1x128xf32, #tpu.memory_space<vmem>>, %arg4: memref<128x128xf32, #tpu.memory_space<vmem>>, %arg5: memref<1x128xf32, #tpu.memory_space<vmem>>, %arg6: memref<16x128xf32, #tpu.memory_space<vmem>>) attributes {dimension_semantics = [#tpu.dimension_semantics<parallel>], iteration_bounds = array<i64: 1>, scalar_prefetch = 0 : i64, scratch_operands = 0 : i64, tpu.core_type = #tpu.core_type<tc>, window_params = [{transform_indices = @transform_0, window_bounds = array<i64: 16, 64>}, {pipeline_mode = #tpu.pipeline_mode<synchronous>, transform_indices = @transform_1, window_bounds = array<i64: 64, 128>}, {pipeline_mode = #tpu.pipeline_mode<synchronous>, transform_indices = @transform_2, window_bounds = array<i64: 1, 128>}, {pipeline_mode = #tpu.pipeline_mode<synchronous>, transform_indices = @transform_3, window_bounds = array<i64: 128, 128>}, {pipeline_mode = #tpu.pipeline_mode<synchronous>, transform_indices = @transform_4, window_bounds = array<i64: 1, 128>}, {transform_indices = @transform_5, window_bounds = array<i64: 16, 128>}]} {
    %c0 = arith.constant 0 : index
    %c0_0 = arith.constant 0 : index
    %0 = vector.load %arg1[%c0, %c0_0] : memref<16x64xf32, #tpu.memory_space<vmem>>, vector<16x64xf32>
    %1 = arith.truncf %0 : vector<16x64xf32> to vector<16x64xbf16>
    %c0_1 = arith.constant 0 : index
    %c0_2 = arith.constant 0 : index
    %2 = vector.load %arg2[%c0_1, %c0_2] : memref<64x128xbf16, #tpu.memory_space<vmem>>, vector<64x128xbf16>
    %cst = arith.constant dense<0.000000e+00> : vector<16x128xf32>
    %3 = tpu.matmul %1, %2, %cst {dimension_numbers = #tpu.dot_dimension_numbers<[1], [0], [0], [1], [0, 0, 1, 1], [], []>} : vector<16x64xbf16>, vector<64x128xbf16>, vector<16x128xf32> -> vector<16x128xf32>
    %c0_3 = arith.constant 0 : index
    %c0_4 = arith.constant 0 : index
    %4 = vector.load %arg3[%c0_3, %c0_4] : memref<1x128xf32, #tpu.memory_space<vmem>>, vector<1x128xf32>
    %5 = vector.broadcast %4 : vector<1x128xf32> to vector<16x128xf32>
    %6 = arith.addf %3, %5 : vector<16x128xf32>
    %cst_5 = arith.constant 0.000000e+00 : f32
    %7 = vector.broadcast %cst_5 : f32 to vector<16x128xf32>
    %8 = arith.maximumf %6, %7 : vector<16x128xf32>
    %c0_6 = arith.constant 0 : index
    %c0_7 = arith.constant 0 : index
    %9 = vector.load %arg4[%c0_6, %c0_7] : memref<128x128xf32, #tpu.memory_space<vmem>>, vector<128x128xf32>
    %cst_8 = arith.constant dense<0.000000e+00> : vector<16x128xf32>
    %10 = tpu.matmul %8, %9, %cst_8 {dimension_numbers = #tpu.dot_dimension_numbers<[1], [0], [0], [1], [0, 0, 1, 1], [], []>} : vector<16x128xf32>, vector<128x128xf32>, vector<16x128xf32> -> vector<16x128xf32>
    %c0_9 = arith.constant 0 : index
    %c0_10 = arith.constant 0 : index
    %11 = vector.load %arg5[%c0_9, %c0_10] : memref<1x128xf32, #tpu.memory_space<vmem>>, vector<1x128xf32>
    %12 = vector.broadcast %11 : vector<1x128xf32> to vector<16x128xf32>
    %13 = arith.addf %10, %12 : vector<16x128xf32>
    %c0_11 = arith.constant 0 : index
    %c0_12 = arith.constant 0 : index
    %14 = vector.load %arg6[%c0_11, %c0_12] : memref<16x128xf32, #tpu.memory_space<vmem>>, vector<16x128xf32>
    tpu.vector_store %arg6[%c0_11, %c0_12], %13 {strides = array<i32>} : memref<16x128xf32, #tpu.memory_space<vmem>>, vector<16x128xf32>,
    return
  }
  func.func @transform_0(%arg0: i32) -> (i32, i32) {
    %c0_i32 = arith.constant 0 : i32
    %c0_i32_0 = arith.constant 0 : i32
    return %arg0, %c0_i32 : i32, i32
  }
  func.func @transform_1(%arg0: i32) -> (i32, i32) {
    %c0_i32 = arith.constant 0 : i32
    %c0_i32_0 = arith.constant 0 : i32
    %c0_i32_1 = arith.constant 0 : i32
    return %c0_i32, %c0_i32_0 : i32, i32
  }
  func.func @transform_2(%arg0: i32) -> (i32, i32) {
    %c0_i32 = arith.constant 0 : i32
    %c0_i32_0 = arith.constant 0 : i32
    %c0_i32_1 = arith.constant 0 : i32
    return %c0_i32, %c0_i32_0 : i32, i32
  }
  func.func @transform_3(%arg0: i32) -> (i32, i32) {
    %c0_i32 = arith.constant 0 : i32
    %c0_i32_0 = arith.constant 0 : i32
    %c0_i32_1 = arith.constant 0 : i32
    return %c0_i32, %c0_i32_0 : i32, i32
  }
  func.func @transform_4(%arg0: i32) -> (i32, i32) {
    %c0_i32 = arith.constant 0 : i32
    %c0_i32_0 = arith.constant 0 : i32
    %c0_i32_1 = arith.constant 0 : i32
    return %c0_i32, %c0_i32_0 : i32, i32
  }
  func.func @transform_5(%arg0: i32) -> (i32, i32) {
    %c0_i32 = arith.constant 0 : i32
    %c0_i32_0 = arith.constant 0 : i32
    return %arg0, %c0_i32 : i32, i32
  }
}

</mosaic_0001>

<bundles_post_ra>
// kernel: tpu_custom_call.1
= control target key start
LH: loop header
LB: loop body
LE: loop exit
PB: predicated region body
PF: predicated region fallthrough
CT: control target
= control target key end

     0   :  { %10 = vsyncpa [#allocation3], 0  ;;  %s514_s0 = inlined_call_operand.hbm [shape: f32[16,64], index: 0, kind: input, shape index: {}]   ;;  %s515_s1 = inlined_call_operand.hbm [shape: bf16[64,128], index: 1, kind: input, shape index: {}]   ;;  %s516_s2 = inlined_call_operand.vmem [shape: f32[1,128], index: 2, kind: input, shape index: {}]   ;;  %s517_s3 = inlined_call_operand.hbm [shape: f32[128,128], index: 3, kind: input, shape index: {}]   ;;  %s518_s4 = inlined_call_operand.vmem [shape: f32[1,128], index: 4, kind: input, shape index: {}]   ;;  %s519_s5 = inlined_call_operand.hbm [shape: f32[16,128], index: 5, kind: output, shape index: {}]  }
   0x1   :  { %11 = vsyncpa [#allocation6], 0 }
   0x2   :  { %12 = vsyncpa [#allocation4], 0  ;;  %s447_s18 = smov [#allocation5]  }
   0x3   :  { %s30_s19 = sshll.u32 %s447_s18, 4  ;;  %s31_s19 = int_to_ptr.vmem [resolvable:$true] %s30_s19 }
   0x4   :  { %s369_s20 = scalar_lea.vmem %s31_s19, 512  ;;  %p374_p1 = scmp.lt.s32.totalorder %s31_s19, %s31_s19 }
   0x5   :  { %p370_p0 = scmp.ne.s32.totalorder %s31_s19, %s369_s20  ;;  %p375_p2 = scmp.lt.s32.totalorder %s369_s20, %s369_s20 }
   0x7   :  { %p376_p3 = por %p375_p2, %p374_p1 }
   0x9   :  { %p377_p4 = pnand %p376_p3, %p370_p0 }
   0xb   :  { %380 = shalt.err (!%p377_p4)
}
   0xc   :  { %s448_s21 = smov 64   ;;  %s449_s22 = smov 4  }
   0xd   :  { %36 = dma.hbm_to_vmem [thread:$0]  %s515_s1, 512, %s31_s19, [#allocation6], %s448_s21, %s448_s21, %s449_s22  }
   0xe   :  { %s450_s25 = smov [#allocation2]  }
   0xf   :  { %s18_s26 = sshll.u32 %s450_s25, 4  ;;  %s19_s26 = int_to_ptr.vmem [resolvable:$true] %s18_s26 }
  0x10   :  { %s389_s27 = scalar_lea.vmem %s19_s26, 256  ;;  %p394_p6 = scmp.lt.s32.totalorder %s19_s26, %s19_s26 }
  0x11   :  { %p390_p5 = scmp.ne.s32.totalorder %s19_s26, %s389_s27  ;;  %p395_p7 = scmp.lt.s32.totalorder %s389_s27, %s389_s27 }
  0x13   :  { %p396_p8 = por %p395_p7, %p394_p6 }
  0x15   :  { %p397_p9 = pnand %p396_p8, %p390_p5 }
  0x17   :  { %400 = shalt.err (!%p397_p9)
}
  0x18   :  { %s451_s28 = smov 128   ;;  %s452_s29 = smov 8  }
  0x19   :  { %24 = dma.hbm_to_vmem [thread:$0]  %s514_s0, 256, %s19_s26, [#allocation3], %s451_s28, %s451_s28, %s452_s29  }
  0x1a   :  { %s453_s1 = smov [#allocation7]  }
  0x1b   :  { %s44_s7 = sshll.u32 %s453_s1, 4  ;;  %s45_s7 = int_to_ptr.vmem [resolvable:$true] %s44_s7 }
  0x1c   :  { %s409_s8 = scalar_lea.vmem %s45_s7, 2048  ;;  %p414_p11 = scmp.lt.s32.totalorder %s45_s7, %s45_s7 }
  0x1d   :  { %p410_p10 = scmp.ne.s32.totalorder %s45_s7, %s409_s8  ;;  %p415_p12 = scmp.lt.s32.totalorder %s409_s8, %s409_s8 }
  0x1f   :  { %p416_p13 = por %p415_p12, %p414_p11 }
  0x21   :  { %p417_p0 = pnand %p416_p13, %p410_p10 }
  0x23   :  { %420 = shalt.err (!%p417_p0)
}
  0x24   :  { %50 = dma.hbm_to_vmem [thread:$0]  %s517_s3, 2048, %s45_s7, [#allocation6], %s451_s28, %s451_s28, %s452_s29  }
  0x25   :  { %441 = dma.done.wait [#allocation3], 256  }
  0x26   :  { %442 = vsyncadd [#allocation3], 4294967040 }
  0x27   :  { %443 = dma.done.wait [#allocation6], 2560  }
  0x28   :  { %444 = vsyncadd [#allocation6], 4294964736  ;;  %v454_v0 = vmov 0.0   ;;  %vm455_vm0 = vmmov 0   ;;  %v357_v1 = vld [vmem:[#allocation5 + $0x18] sm:$0xff]   ;;  %v358_v2 = vld [vmem:[#allocation5 + $0x10] sm:$0xff]  }
  0x29   :  { %300 = vmatprep.subr.bf16.mxu0 %v454_v0  ;;  %308 = vmatprep.mubr.msk.bf16.mxu0 %vm455_vm0, %v454_v0  ;;  %v167_v3 = vld [vmem:[#allocation7 + $0x78] sm:$0xff]  ;;  %v166_v4 = vld [vmem:[#allocation7 + $0x70] sm:$0xff]  ;;  %v359_v5 = vld [vmem:[#allocation5 + $0x8] sm:$0xff]   ;;  %vm105_vm1 = vcmask 523264   ;;  %s456_s13 = smov [#allocation8]  }
  0x2a   :  { %301 = vmatpush3.bf16.msra.mxu0 %v357_v1  ;;  %312 = vmatprep.subr.mxu1 %v167_v3  ;;  %v165_v6 = vld [vmem:[#allocation7 + $0x68] sm:$0xff]  ;;  %v164_v7 = vld [vmem:[#allocation7 + $0x60] sm:$0xff]  ;;  %v63_v9 = vld [vmem:[#allocation2] sm:$0xff]  ;;  %s257_s14 = sshll.u32 %s456_s13, 4  ;;  %s258_s14 = int_to_ptr.vmem [resolvable:$true] %s257_s14 }
  0x2b   :  { %302 = vmatprep.subr.bf16.mxu0 %v454_v0  ;;  %313 = vmatpush3.msra.mxu1 %v167_v3  ;;  %v360_v8 = vld [vmem:[#allocation5] sm:$0xff]   ;;  %v64_v10 = vld [vmem:[#allocation2 + $0x8] sm:$0xff]  ;;  %v162_v12 = vld [vmem:[#allocation7 + $0x50] sm:$0xff]  ;;  %p426_p2 = scmp.lt.s32.totalorder %s258_s14, %s258_s14 }
  0x2c   :  { %314 = vmatprep.subr.mxu1 %v166_v4  ;;  %v163_v11 = vld [vmem:[#allocation7 + $0x58] sm:$0xff]  ;;  %v65_v13 = vpack.c.bf16 %v64_v10, %v63_v9  ;;  %v161_v14 = vld [vmem:[#allocation7 + $0x48] sm:$0xff]  ;;  %v160_v15 = vld [vmem:[#allocation7 + $0x40] sm:$0xff] }
  0x2d   :  { %315 = vmatpush3.msra.mxu1 %v166_v4  ;;  %v159_v16 = vld [vmem:[#allocation7 + $0x38] sm:$0xff]  ;;  %v158_v17 = vld [vmem:[#allocation7 + $0x30] sm:$0xff]  ;;  %v157_v18 = vld [vmem:[#allocation7 + $0x28] sm:$0xff] }
  0x2e   :  { %303 = vmatpush3.bf16.msra.mxu0 %v358_v2  ;;  %316 = vmatprep.subr.mxu1 %v165_v6  ;;  %v156_v19 = vld [vmem:[#allocation7 + $0x20] sm:$0xff]  ;;  %v155_v20 = vld [vmem:[#allocation7 + $0x18] sm:$0xff]  ;;  %v154_v21 = vld [vmem:[#allocation7 + $0x10] sm:$0xff] }
  0x2f   :  { %304 = vmatprep.subr.bf16.mxu0 %v454_v0  ;;  %317 = vmatpush3.msra.mxu1 %v165_v6  ;;  %v153_v22 = vld [vmem:[#allocation7 + $0x8] sm:$0xff]  ;;  %v152_v23 = vld [vmem:[#allocation7] sm:$0xff]  ;;  %v270_v24 = vld [vmem:[%s516_s2] ss:$0 sm:$0xff]  ;;  %s421_s2 = scalar_lea.vmem %s258_s14, 256 }
  0x30   :  { %318 = vmatprep.subr.mxu1 %v164_v7  ;;  %v276_v33 = vld [vmem:[%s518_s4] ss:$0 sm:$0xff]  ;;  %p422_p1 = scmp.ne.s32.totalorder %s258_s14, %s421_s2  ;;  %p427_p3 = scmp.lt.s32.totalorder %s421_s2, %s421_s2 }
  0x31   :  { %319 = vmatpush3.msra.mxu1 %v164_v7 }
  0x32   :  { %305 = vmatpush3.bf16.msra.mxu0 %v359_v5  ;;  %320 = vmatprep.subr.mxu1 %v163_v11  ;;  %p428_p4 = por %p427_p3, %p426_p2 }
  0x33   :  { %306 = vmatprep.subr.bf16.mxu0 %v454_v0  ;;  %321 = vmatpush3.msra.mxu1 %v163_v11 }
  0x34   :  { %322 = vmatprep.subr.mxu1 %v162_v12  ;;  %p429_p5 = pnand %p428_p4, %p422_p1 }
  0x35   :  { %323 = vmatpush3.msra.mxu1 %v162_v12 }
  0x36   :  { %307 = vmatpush3.bf16.msra.mxu0 %v360_v8  ;;  %324 = vmatprep.subr.mxu1 %v161_v14 }
  0x37   :  { %325 = vmatpush3.msra.mxu1 %v161_v14 }
  0x38   :  { %326 = vmatprep.subr.mxu1 %v160_v15 }
  0x39   :  { %309 = vmatmul.mubr.msk.bf16.vlgmr.msra.gmra.mxu0 %vm105_vm1, %v65_v13  ;;  %327 = vmatpush3.msra.mxu1 %v160_v15 }
  0x3a   :  { %328 = vmatprep.subr.mxu1 %v159_v16 }
  0x3b   :  { %329 = vmatpush3.msra.mxu1 %v159_v16 }
  0x3c   :  { %330 = vmatprep.subr.mxu1 %v158_v17 }
  0x3d   :  { %331 = vmatpush3.msra.mxu1 %v158_v17 }
  0x3e   :  { %332 = vmatprep.subr.mxu1 %v157_v18 }
  0x3f   :  { %333 = vmatpush3.msra.mxu1 %v157_v18 }
  0x40   :  { %334 = vmatprep.subr.mxu1 %v156_v19 }
  0x41   :  { %335 = vmatpush3.msra.mxu1 %v156_v19 }
  0x42   :  { %336 = vmatprep.subr.mxu1 %v155_v20 }
  0x43   :  { %337 = vmatpush3.msra.mxu1 %v155_v20 }
  0x44   :  { %338 = vmatprep.subr.mxu1 %v154_v21 }
  0x45   :  { %339 = vmatpush3.msra.mxu1 %v154_v21 }
  0x46   :  { %340 = vmatprep.subr.mxu1 %v153_v22 }
  0x47   :  { %341 = vmatpush3.msra.mxu1 %v153_v22 }
  0x48   :  { %342 = vmatprep.subr.mxu1 %v152_v23 }
  0x49   :  { %343 = vmatpush3.msra.mxu1 %v152_v23 }
  0xf9   :  { %v143_v25 = vpop.f32.mrf.mxu0 }
  0xfa   :  { %v144_v26 = vadd.f32 %v270_v24, %v143_v25 }
  0xfb   :  { %v310_v27 = vpop.f32.mrf.mxu0 }
  0xfc   :  { %v150_v28 = vmax.f32 %v144_v26, 0.0 }
  0xfd   :  { %v146_v29 = vpop.f32.mrf.mxu0 }
  0xfe   :  { %v147_v30 = vadd.f32 %v270_v24, %v146_v29  ;;  %344 = vmatprep.mubr.f32.mxu1 %v150_v28 }
  0xff   :  { %v311_v31 = vpop.f32.mrf.mxu0 }
 0x100   :  { %v151_v32 = vmax.f32 %v147_v30, 0.0 }
 0x102   :  { %345 = vmatmul.mubr.f32.vlgmr.msra.gmra.mxu1 %v151_v32 }
 0x1c2   :  { %v346_v34 = vpop.f32.mrf.mxu1 }
 0x1c3   :  { %v247_v35 = vadd.f32 %v346_v34, %v276_v33 }
 0x1c4   :  { %v241_v36 = vpop.f32.mrf.mxu1 }
 0x1c5   :  { %251 = vst [vmem:[#allocation8 + $0x8] sm:$0xff] %v247_v35  ;;  %v242_v37 = vadd.f32 %v276_v33, %v241_v36 }
 0x1c7   :  { %250 = vst [vmem:[#allocation8] sm:$0xff] %v242_v37 }
 0x1c8   :  { %432 = shalt.err (!%p429_p5)
}
 0x1c9   :  { %263 = dma.vmem_to_hbm [thread:$0]  %s258_s14, 256, %s519_s5, [#allocation4], %s451_s28, %s451_s28, %s452_s29  }
 0x1ca   :  { %445 = dma.done.wait [#allocation4], 256  }
 0x1cb   :  { %446 = vsyncadd [#allocation4], 4294967040 }
 0x1cc   :  { %267 = vsyncpa [#allocation3], 1 }
 0x1cd   :  { %268 = vsyncpa [#allocation6], 1 }
 0x1ce   :  { %269 = vsyncpa [#allocation4], 1 }

</bundles_post_ra>
